<compile_context>
chip_gen: v6e
topology: v6e:2x2x1
jax: 0.10.0
libtpu: 0.0.40
codegen_flags: <defaults>
</compile_context>

<pallas_src>
import math

import jax
import jax.numpy as jnp
from jax.experimental import pallas as pl
from jax.experimental.pallas import tpu as pltpu


def _round_up(x, m):
    return (x + m - 1) // m * m


def dqn_kernel(x_ref, w1_ref, b1_ref, w2_ref, b2_ref, w3_ref, b3_ref, out_ref):
    # x_ref: (tm, F_pad); w1: (F_pad, 256); w2: (256, 256); w3: (256, A_pad)
    # biases (f32): (1, 256), (1, 256), (1, A_pad); out_ref: (tm, A_pad)
    wdt = w1_ref.dtype  # MXU operand dtype (bf16 by default, f32 supported)
    x = x_ref[...].astype(wdt)
    h1 = jnp.maximum(
        jnp.dot(x, w1_ref[...], preferred_element_type=jnp.float32) + b1_ref[...],
        0.0,
    )
    h2 = jnp.maximum(
        jnp.dot(h1.astype(wdt), w2_ref[...], preferred_element_type=jnp.float32)
        + b2_ref[...],
        0.0,
    )
    y = (
        jnp.dot(h2.astype(wdt), w3_ref[...], preferred_element_type=jnp.float32)
        + b3_ref[...]
    )
    out_ref[...] = y.astype(out_ref.dtype)


def _pick_batch_tile(B, tm_target):
    """Padding-aware, sublane-aligned batch tile; >=2 tiles when B allows it."""
    if B <= 8:
        return 8
    num_tiles = max(pl.cdiv(B, tm_target), 2 if B >= 16 else 1)
    return _round_up(pl.cdiv(B, num_tiles), 8)


def dqn_forward_batched(xb, params, n_actions, *, tm=None, tm_target=512,
                        out_dtype=jnp.float32):
    """Batched DQN forward.  xb: (B, *n_dimensions) -> (B, n_actions)."""
    w1, b1, w2, b2, w3, b3 = params
    F_pad = w1.shape[0]
    H1 = w1.shape[1]
    H2 = w2.shape[1]

    # Guarantee lane-dense (multiple-of-128) output stores even if a caller
    # hands in an unpadded final layer.
    A_pad = w3.shape[1]
    if A_pad % 128 != 0:
        extra = _round_up(A_pad, 128) - A_pad
        w3 = jnp.pad(w3, ((0, 0), (0, extra)))
        b3 = jnp.pad(b3, ((0, 0), (0, extra)))
        A_pad += extra
    assert n_actions <= A_pad

    B = xb.shape[0]
    x_flat = jnp.reshape(xb, (B, -1)).astype(jnp.float32)
    F_in = x_flat.shape[1]
    assert F_in <= F_pad, (F_in, F_pad)
    if F_in != F_pad:  # pad flatten dim to the (128-aligned) weight input dim
        x_flat = jnp.pad(x_flat, ((0, 0), (0, F_pad - F_in)))

    # Batch tile selection (padding-aware, 8-sublane aligned).
    if tm is None:
        tm = _pick_batch_tile(B, tm_target)
    else:
        tm = _round_up(tm, 8)
    B_pad = _round_up(B, tm)
    if B_pad != B:
        x_flat = jnp.pad(x_flat, ((0, B_pad - B), (0, 0)))
    n_tiles = B_pad // tm
    grid = (n_tiles,)

    out_itemsize = jnp.dtype(out_dtype).itemsize
    weight_bytes = sum(
        int(p.size) * p.dtype.itemsize for p in (w1, b1, w2, b2, w3, b3)
    )
    flops = 2 * B_pad * (F_pad * H1 + H1 * H2 + H2 * A_pad)
    bytes_accessed = (
        B_pad * F_pad * 4 + weight_bytes + B_pad * A_pad * out_itemsize
    )
    cost = pl.CostEstimate(
        flops=int(flops), transcendentals=0, bytes_accessed=int(bytes_accessed)
    )

    # Explicit VMEM budget: resident weights (worst case double-buffered),
    # double-buffered x/out tiles, plus f32 activation temporaries.
    stream_bytes = 2 * tm * (F_pad * 4 + A_pad * out_itemsize)
    temp_bytes = tm * (F_pad * 2 + (H1 + H2) * 4 + A_pad * 4)
    vmem_needed = 2 * weight_bytes + stream_bytes + temp_bytes
    vmem_limit = int(min(max(2 * vmem_needed + (4 << 20), 32 << 20), 64 << 20))

    def run(single_buffer_weights):
        def resident(shape):
            # Full-array block, same block every grid step -> VMEM-resident.
            if single_buffer_weights:
                return pl.BlockSpec(
                    shape, lambda i: (0, 0), pipeline_mode=pl.Buffered(1)
                )
            return pl.BlockSpec(shape, lambda i: (0, 0))

        return pl.pallas_call(
            dqn_kernel,
            out_shape=jax.ShapeDtypeStruct((B_pad, A_pad), out_dtype),
            grid=grid,
            in_specs=[
                pl.BlockSpec((tm, F_pad), lambda i: (i, 0)),  # x: tiled over batch
                resident(w1.shape),
                resident(b1.shape),
                resident(w2.shape),
                resident(b2.shape),
                resident(w3.shape),
                resident(b3.shape),
            ],
            out_specs=pl.BlockSpec((tm, A_pad), lambda i: (i, 0)),
            compiler_params=pltpu.CompilerParams(
                dimension_semantics=(pltpu.PARALLEL,),
                vmem_limit_bytes=vmem_limit,
            ),
            cost_estimate=cost,
        )(x_flat, w1, b1, w2, b2, w3, b3)

    want_single_buffer = hasattr(pl, "Buffered")
    try:
        out = run(want_single_buffer)
    except Exception:  # pipeline_mode unsupported in this jax build -> fall back
        if not want_single_buffer:
            raise
        out = run(False)

    return out[:B, :n_actions]


def dqn_forward(x, params, n_actions):
    """Single-sample forward matching torch's DQN.forward (x.view(-1) -> (n_actions,)).

    NOTE: callers should prefer dqn_forward_batched — at B=1 this kernel is
    dominated by dispatch + weight DMA, not compute.
    """
    x_row = jnp.reshape(x, (1, -1))
    return dqn_forward_batched(x_row, params, n_actions)[0]


def init_dqn_params(key, n_dimensions, n_actions, weight_dtype=jnp.bfloat16):
    """Mirror nn.Linear default init U(-1/sqrt(fan_in), 1/sqrt(fan_in)).

    Weights are stored pre-transposed as (in_features, out_features).  The
    first layer's input axis and the final layer's output axis are zero-padded
    to multiples of 128 (lane-dense DMA / MXU alignment; zero rows and the
    wrapper's [:, :n_actions] slice keep the math identical).  Biases stay f32.
    """
    flatten = n_dimensions[0] * n_dimensions[1]
    f_pad = _round_up(max(flatten, 1), 128)
    a_pad = _round_up(max(n_actions, 1), 128)
    layer_dims = [
        (flatten, f_pad, 256, 256),
        (256, 256, 256, 256),
        (256, 256, n_actions, a_pad),
    ]
    params = []
    for fan_in, in_pad, fan_out, out_pad in layer_dims:
        key, kw, kb = jax.random.split(key, 3)
        bound = 1.0 / math.sqrt(fan_in)
        w = jax.random.uniform(kw, (fan_in, fan_out), jnp.float32, -bound, bound)
        b = jax.random.uniform(kb, (1, fan_out), jnp.float32, -bound, bound)
        w = jnp.pad(w, ((0, in_pad - fan_in), (0, out_pad - fan_out)))
        b = jnp.pad(b, ((0, 0), (0, out_pad - fan_out)))
        params += [w.astype(weight_dtype), b]  # bias stays f32
    return params


def dqn_forward_ref(x, params, n_actions):
    """Pure-JAX reference (same dtype/padding handling as the kernel)."""
    w1, b1, w2, b2, w3, b3 = params
    wdt = w1.dtype
    h = jnp.reshape(x, (1, -1)).astype(jnp.float32)
    if h.shape[1] != w1.shape[0]:
        h = jnp.pad(h, ((0, 0), (0, w1.shape[0] - h.shape[1])))
    h = jnp.maximum(
        jnp.dot(h.astype(wdt), w1, preferred_element_type=jnp.float32) + b1, 0.0
    )
    h = jnp.maximum(
        jnp.dot(h.astype(wdt), w2, preferred_element_type=jnp.float32) + b2, 0.0
    )
    y = jnp.dot(h.astype(wdt), w3, preferred_element_type=jnp.float32) + b3
    return y[0, :n_actions]


if __name__ == "__main__":
    key = jax.random.PRNGKey(0)
    n_dimensions = (9, 14)  # flatten = 126 -> padded to 128 (exercises F padding)
    n_actions = 4

    key, kx, kb = jax.random.split(key, 3)
    x = jax.random.normal(kx, n_dimensions, dtype=jnp.float32)

    # bf16 MXU operands by default (f32 accumulate, f32 bias/ReLU in kernel).
    params = init_dqn_params(key, n_dimensions, n_actions)

    # 1) Single-sample forward (exact semantics of the torch module: view(-1)).
    out = jax.block_until_ready(dqn_forward(x, params, n_actions))
    ref = dqn_forward_ref(x, params, n_actions)
    assert out.shape == (n_actions,)
    assert jnp.allclose(out, ref, atol=5e-3, rtol=5e-3), (out, ref)

    # 2) Batched forward: B=20 -> adaptive tm=16, grid=(2,), weights VMEM-resident.
    B = 20
    xb = jax.random.normal(kb, (B,) + n_dimensions, dtype=jnp.float32)
    outb = jax.block_until_ready(dqn_forward_batched(xb, params, n_actions))
    refb = jax.vmap(lambda s: dqn_forward_ref(s, params, n_actions))(xb)
    assert outb.shape == (B, n_actions)
    assert jnp.allclose(outb, refb, atol=5e-3, rtol=5e-3), (outb, refb)

    # 3) f32 weight path still supported (exact nn.Linear numerics if wanted).
    params_f32 = init_dqn_params(key, n_dimensions, n_actions,
                                 weight_dtype=jnp.float32)
    out32 = jax.block_until_ready(dqn_forward(x, params_f32, n_actions))
    ref32 = dqn_forward_ref(x, params_f32, n_actions)
    assert jnp.allclose(out32, ref32, atol=1e-4, rtol=1e-4), (out32, ref32)

    # 4) bf16 output (halves padded-lane writeback in the large-B mem-bound regime).
    outb16 = jax.block_until_ready(
        dqn_forward_batched(xb, params, n_actions, out_dtype=jnp.bfloat16))
    assert outb16.dtype == jnp.bfloat16
    assert jnp.allclose(outb16.astype(jnp.float32), refb, atol=3e-2, rtol=3e-2)

    print("KERNEL_OK")
</pallas_src>

<mosaic_0001>
module attributes {stable_mosaic.version = 11 : i64} {
  func.func @dqn_kernel(%arg0: i32, %arg1: memref<8x128xf32, #tpu.memory_space<vmem>>, %arg2: memref<128x256xbf16, #tpu.memory_space<vmem>>, %arg3: memref<1x256xf32, #tpu.memory_space<vmem>>, %arg4: memref<256x256xbf16, #tpu.memory_space<vmem>>, %arg5: memref<1x256xf32, #tpu.memory_space<vmem>>, %arg6: memref<256x128xbf16, #tpu.memory_space<vmem>>, %arg7: memref<1x128xf32, #tpu.memory_space<vmem>>, %arg8: memref<8x128xf32, #tpu.memory_space<vmem>>) attributes {dimension_semantics = [#tpu.dimension_semantics<parallel>], iteration_bounds = array<i64: 1>, scalar_prefetch = 0 : i64, scratch_operands = 0 : i64, tpu.core_type = #tpu.core_type<tc>, window_params = [{transform_indices = @transform_0, window_bounds = array<i64: 8, 128>}, {pipeline_mode = #tpu.pipeline_mode<synchronous>, transform_indices = @transform_1, window_bounds = array<i64: 128, 256>}, {pipeline_mode = #tpu.pipeline_mode<synchronous>, transform_indices = @transform_2, window_bounds = array<i64: 1, 256>}, {pipeline_mode = #tpu.pipeline_mode<synchronous>, transform_indices = @transform_3, window_bounds = array<i64: 256, 256>}, {pipeline_mode = #tpu.pipeline_mode<synchronous>, transform_indices = @transform_4, window_bounds = array<i64: 1, 256>}, {pipeline_mode = #tpu.pipeline_mode<synchronous>, transform_indices = @transform_5, window_bounds = array<i64: 256, 128>}, {pipeline_mode = #tpu.pipeline_mode<synchronous>, transform_indices = @transform_6, window_bounds = array<i64: 1, 128>}, {transform_indices = @transform_7, window_bounds = array<i64: 8, 128>}]} {
    %c0 = arith.constant 0 : index
    %c0_0 = arith.constant 0 : index
    %0 = vector.load %arg1[%c0, %c0_0] : memref<8x128xf32, #tpu.memory_space<vmem>>, vector<8x128xf32>
    %1 = arith.truncf %0 : vector<8x128xf32> to vector<8x128xbf16>
    %c0_1 = arith.constant 0 : index
    %c0_2 = arith.constant 0 : index
    %2 = vector.load %arg2[%c0_1, %c0_2] : memref<128x256xbf16, #tpu.memory_space<vmem>>, vector<128x256xbf16>
    %cst = arith.constant dense<0.000000e+00> : vector<8x256xf32>
    %3 = tpu.matmul %1, %2, %cst {dimension_numbers = #tpu.dot_dimension_numbers<[1], [0], [0], [1], [0, 0, 1, 1], [], []>} : vector<8x128xbf16>, vector<128x256xbf16>, vector<8x256xf32> -> vector<8x256xf32>
    %c0_3 = arith.constant 0 : index
    %c0_4 = arith.constant 0 : index
    %4 = vector.load %arg3[%c0_3, %c0_4] : memref<1x256xf32, #tpu.memory_space<vmem>>, vector<1x256xf32>
    %5 = vector.broadcast %4 : vector<1x256xf32> to vector<8x256xf32>
    %6 = arith.addf %3, %5 : vector<8x256xf32>
    %cst_5 = arith.constant 0.000000e+00 : f32
    %7 = vector.broadcast %cst_5 : f32 to vector<8x256xf32>
    %8 = arith.maximumf %6, %7 : vector<8x256xf32>
    %9 = arith.truncf %8 : vector<8x256xf32> to vector<8x256xbf16>
    %c0_6 = arith.constant 0 : index
    %c0_7 = arith.constant 0 : index
    %10 = vector.load %arg4[%c0_6, %c0_7] : memref<256x256xbf16, #tpu.memory_space<vmem>>, vector<256x256xbf16>
    %cst_8 = arith.constant dense<0.000000e+00> : vector<8x256xf32>
    %11 = tpu.matmul %9, %10, %cst_8 {dimension_numbers = #tpu.dot_dimension_numbers<[1], [0], [0], [1], [0, 0, 1, 1], [], []>} : vector<8x256xbf16>, vector<256x256xbf16>, vector<8x256xf32> -> vector<8x256xf32>
    %c0_9 = arith.constant 0 : index
    %c0_10 = arith.constant 0 : index
    %12 = vector.load %arg5[%c0_9, %c0_10] : memref<1x256xf32, #tpu.memory_space<vmem>>, vector<1x256xf32>
    %13 = vector.broadcast %12 : vector<1x256xf32> to vector<8x256xf32>
    %14 = arith.addf %11, %13 : vector<8x256xf32>
    %cst_11 = arith.constant 0.000000e+00 : f32
    %15 = vector.broadcast %cst_11 : f32 to vector<8x256xf32>
    %16 = arith.maximumf %14, %15 : vector<8x256xf32>
    %17 = arith.truncf %16 : vector<8x256xf32> to vector<8x256xbf16>
    %c0_12 = arith.constant 0 : index
    %c0_13 = arith.constant 0 : index
    %18 = vector.load %arg6[%c0_12, %c0_13] : memref<256x128xbf16, #tpu.memory_space<vmem>>, vector<256x128xbf16>
    %cst_14 = arith.constant dense<0.000000e+00> : vector<8x128xf32>
    %19 = tpu.matmul %17, %18, %cst_14 {dimension_numbers = #tpu.dot_dimension_numbers<[1], [0], [0], [1], [0, 0, 1, 1], [], []>} : vector<8x256xbf16>, vector<256x128xbf16>, vector<8x128xf32> -> vector<8x128xf32>
    %c0_15 = arith.constant 0 : index
    %c0_16 = arith.constant 0 : index
    %20 = vector.load %arg7[%c0_15, %c0_16] : memref<1x128xf32, #tpu.memory_space<vmem>>, vector<1x128xf32>
    %21 = vector.broadcast %20 : vector<1x128xf32> to vector<8x128xf32>
    %22 = arith.addf %19, %21 : vector<8x128xf32>
    %c0_17 = arith.constant 0 : index
    %c0_18 = arith.constant 0 : index
    %23 = vector.load %arg8[%c0_17, %c0_18] : memref<8x128xf32, #tpu.memory_space<vmem>>, vector<8x128xf32>
    tpu.vector_store %arg8[%c0_17, %c0_18], %22 {strides = array<i32>} : memref<8x128xf32, #tpu.memory_space<vmem>>, vector<8x128xf32>,
    return
  }
  func.func @transform_0(%arg0: i32) -> (i32, i32) {
    %c0_i32 = arith.constant 0 : i32
    %c0_i32_0 = arith.constant 0 : i32
    return %arg0, %c0_i32 : i32, i32
  }
  func.func @transform_1(%arg0: i32) -> (i32, i32) {
    %c0_i32 = arith.constant 0 : i32
    %c0_i32_0 = arith.constant 0 : i32
    %c0_i32_1 = arith.constant 0 : i32
    return %c0_i32, %c0_i32_0 : i32, i32
  }
  func.func @transform_2(%arg0: i32) -> (i32, i32) {
    %c0_i32 = arith.constant 0 : i32
    %c0_i32_0 = arith.constant 0 : i32
    %c0_i32_1 = arith.constant 0 : i32
    return %c0_i32, %c0_i32_0 : i32, i32
  }
  func.func @transform_3(%arg0: i32) -> (i32, i32) {
    %c0_i32 = arith.constant 0 : i32
    %c0_i32_0 = arith.constant 0 : i32
    %c0_i32_1 = arith.constant 0 : i32
    return %c0_i32, %c0_i32_0 : i32, i32
  }
  func.func @transform_4(%arg0: i32) -> (i32, i32) {
    %c0_i32 = arith.constant 0 : i32
    %c0_i32_0 = arith.constant 0 : i32
    %c0_i32_1 = arith.constant 0 : i32
    return %c0_i32, %c0_i32_0 : i32, i32
  }
  func.func @transform_5(%arg0: i32) -> (i32, i32) {
    %c0_i32 = arith.constant 0 : i32
    %c0_i32_0 = arith.constant 0 : i32
    %c0_i32_1 = arith.constant 0 : i32
    return %c0_i32, %c0_i32_0 : i32, i32
  }
  func.func @transform_6(%arg0: i32) -> (i32, i32) {
    %c0_i32 = arith.constant 0 : i32
    %c0_i32_0 = arith.constant 0 : i32
    %c0_i32_1 = arith.constant 0 : i32
    return %c0_i32, %c0_i32_0 : i32, i32
  }
  func.func @transform_7(%arg0: i32) -> (i32, i32) {
    %c0_i32 = arith.constant 0 : i32
    %c0_i32_0 = arith.constant 0 : i32
    return %arg0, %c0_i32 : i32, i32
  }
}

module attributes {stable_mosaic.version = 11 : i64} {
  func.func @dqn_kernel(%arg0: i32, %arg1: memref<8x128xf32, #tpu.memory_space<vmem>>, %arg2: memref<128x256xbf16, #tpu.memory_space<vmem>>, %arg3: memref<1x256xf32, #tpu.memory_space<vmem>>, %arg4: memref<256x256xbf16, #tpu.memory_space<vmem>>, %arg5: memref<1x256xf32, #tpu.memory_space<vmem>>, %arg6: memref<256x128xbf16, #tpu.memory_space<vmem>>, %arg7: memref<1x128xf32, #tpu.memory_space<vmem>>, %arg8: memref<8x128xf32, #tpu.memory_space<vmem>>) attributes {dimension_semantics = [#tpu.dimension_semantics<parallel>], iteration_bounds = array<i64: 1>, scalar_prefetch = 0 : i64, scratch_operands = 0 : i64, tpu.core_type = #tpu.core_type<tc>, window_params = [{transform_indices = @transform_0, window_bounds = array<i64: 8, 128>}, {pipeline_mode = #tpu.pipeline_mode<synchronous>, transform_indices = @transform_1, window_bounds = array<i64: 128, 256>}, {pipeline_mode = #tpu.pipeline_mode<synchronous>, transform_indices = @transform_2, window_bounds = array<i64: 1, 256>}, {pipeline_mode = #tpu.pipeline_mode<synchronous>, transform_indices = @transform_3, window_bounds = array<i64: 256, 256>}, {pipeline_mode = #tpu.pipeline_mode<synchronous>, transform_indices = @transform_4, window_bounds = array<i64: 1, 256>}, {pipeline_mode = #tpu.pipeline_mode<synchronous>, transform_indices = @transform_5, window_bounds = array<i64: 256, 128>}, {pipeline_mode = #tpu.pipeline_mode<synchronous>, transform_indices = @transform_6, window_bounds = array<i64: 1, 128>}, {transform_indices = @transform_7, window_bounds = array<i64: 8, 128>}]} {
    %c0 = arith.constant 0 : index
    %c0_0 = arith.constant 0 : index
    %0 = vector.load %arg1[%c0, %c0_0] : memref<8x128xf32, #tpu.memory_space<vmem>>, vector<8x128xf32>
    %1 = arith.truncf %0 : vector<8x128xf32> to vector<8x128xbf16>
    %c0_1 = arith.constant 0 : index
    %c0_2 = arith.constant 0 : index
    %2 = vector.load %arg2[%c0_1, %c0_2] : memref<128x256xbf16, #tpu.memory_space<vmem>>, vector<128x256xbf16>
    %cst = arith.constant dense<0.000000e+00> : vector<8x256xf32>
    %3 = tpu.matmul %1, %2, %cst {dimension_numbers = #tpu.dot_dimension_numbers<[1], [0], [0], [1], [0, 0, 1, 1], [], []>} : vector<8x128xbf16>, vector<128x256xbf16>, vector<8x256xf32> -> vector<8x256xf32>
    %c0_3 = arith.constant 0 : index
    %c0_4 = arith.constant 0 : index
    %4 = vector.load %arg3[%c0_3, %c0_4] : memref<1x256xf32, #tpu.memory_space<vmem>>, vector<1x256xf32>
    %5 = vector.broadcast %4 : vector<1x256xf32> to vector<8x256xf32>
    %6 = arith.addf %3, %5 : vector<8x256xf32>
    %cst_5 = arith.constant 0.000000e+00 : f32
    %7 = vector.broadcast %cst_5 : f32 to vector<8x256xf32>
    %8 = arith.maximumf %6, %7 : vector<8x256xf32>
    %9 = arith.truncf %8 : vector<8x256xf32> to vector<8x256xbf16>
    %c0_6 = arith.constant 0 : index
    %c0_7 = arith.constant 0 : index
    %10 = vector.load %arg4[%c0_6, %c0_7] : memref<256x256xbf16, #tpu.memory_space<vmem>>, vector<256x256xbf16>
    %cst_8 = arith.constant dense<0.000000e+00> : vector<8x256xf32>
    %11 = tpu.matmul %9, %10, %cst_8 {dimension_numbers = #tpu.dot_dimension_numbers<[1], [0], [0], [1], [0, 0, 1, 1], [], []>} : vector<8x256xbf16>, vector<256x256xbf16>, vector<8x256xf32> -> vector<8x256xf32>
    %c0_9 = arith.constant 0 : index
    %c0_10 = arith.constant 0 : index
    %12 = vector.load %arg5[%c0_9, %c0_10] : memref<1x256xf32, #tpu.memory_space<vmem>>, vector<1x256xf32>
    %13 = vector.broadcast %12 : vector<1x256xf32> to vector<8x256xf32>
    %14 = arith.addf %11, %13 : vector<8x256xf32>
    %cst_11 = arith.constant 0.000000e+00 : f32
    %15 = vector.broadcast %cst_11 : f32 to vector<8x256xf32>
    %16 = arith.maximumf %14, %15 : vector<8x256xf32>
    %17 = arith.truncf %16 : vector<8x256xf32> to vector<8x256xbf16>
    %c0_12 = arith.constant 0 : index
    %c0_13 = arith.constant 0 : index
    %18 = vector.load %arg6[%c0_12, %c0_13] : memref<256x128xbf16, #tpu.memory_space<vmem>>, vector<256x128xbf16>
    %cst_14 = arith.constant dense<0.000000e+00> : vector<8x128xf32>
    %19 = tpu.matmul %17, %18, %cst_14 {dimension_numbers = #tpu.dot_dimension_numbers<[1], [0], [0], [1], [0, 0, 1, 1], [], []>} : vector<8x256xbf16>, vector<256x128xbf16>, vector<8x128xf32> -> vector<8x128xf32>
    %c0_15 = arith.constant 0 : index
    %c0_16 = arith.constant 0 : index
    %20 = vector.load %arg7[%c0_15, %c0_16] : memref<1x128xf32, #tpu.memory_space<vmem>>, vector<1x128xf32>
    %21 = vector.broadcast %20 : vector<1x128xf32> to vector<8x128xf32>
    %22 = arith.addf %19, %21 : vector<8x128xf32>
    %c0_17 = arith.constant 0 : index
    %c0_18 = arith.constant 0 : index
    %23 = vector.load %arg8[%c0_17, %c0_18] : memref<8x128xf32, #tpu.memory_space<vmem>>, vector<8x128xf32>
    tpu.vector_store %arg8[%c0_17, %c0_18], %22 {strides = array<i32>} : memref<8x128xf32, #tpu.memory_space<vmem>>, vector<8x128xf32>,
    return
  }
  func.func @transform_0(%arg0: i32) -> (i32, i32) {
    %c0_i32 = arith.constant 0 : i32
    %c0_i32_0 = arith.constant 0 : i32
    return %arg0, %c0_i32 : i32, i32
  }
  func.func @transform_1(%arg0: i32) -> (i32, i32) {
    %c0_i32 = arith.constant 0 : i32
    %c0_i32_0 = arith.constant 0 : i32
    %c0_i32_1 = arith.constant 0 : i32
    return %c0_i32, %c0_i32_0 : i32, i32
  }
  func.func @transform_2(%arg0: i32) -> (i32, i32) {
    %c0_i32 = arith.constant 0 : i32
    %c0_i32_0 = arith.constant 0 : i32
    %c0_i32_1 = arith.constant 0 : i32
    return %c0_i32, %c0_i32_0 : i32, i32
  }
  func.func @transform_3(%arg0: i32) -> (i32, i32) {
    %c0_i32 = arith.constant 0 : i32
    %c0_i32_0 = arith.constant 0 : i32
    %c0_i32_1 = arith.constant 0 : i32
    return %c0_i32, %c0_i32_0 : i32, i32
  }
  func.func @transform_4(%arg0: i32) -> (i32, i32) {
    %c0_i32 = arith.constant 0 : i32
    %c0_i32_0 = arith.constant 0 : i32
    %c0_i32_1 = arith.constant 0 : i32
    return %c0_i32, %c0_i32_0 : i32, i32
  }
  func.func @transform_5(%arg0: i32) -> (i32, i32) {
    %c0_i32 = arith.constant 0 : i32
    %c0_i32_0 = arith.constant 0 : i32
    %c0_i32_1 = arith.constant 0 : i32
    return %c0_i32, %c0_i32_0 : i32, i32
  }
  func.func @transform_6(%arg0: i32) -> (i32, i32) {
    %c0_i32 = arith.constant 0 : i32
    %c0_i32_0 = arith.constant 0 : i32
    %c0_i32_1 = arith.constant 0 : i32
    return %c0_i32, %c0_i32_0 : i32, i32
  }
  func.func @transform_7(%arg0: i32) -> (i32, i32) {
    %c0_i32 = arith.constant 0 : i32
    %c0_i32_0 = arith.constant 0 : i32
    return %arg0, %c0_i32 : i32, i32
  }
}

</mosaic_0001>

<bundles_post_ra>
// kernel: tpu_custom_call.1
= control target key start
LH: loop header
LB: loop body
LE: loop exit
PB: predicated region body
PF: predicated region fallthrough
CT: control target
= control target key end

     0   :  { %12 = vsyncpa [#allocation3], 0  ;;  %s1045_s0 = inlined_call_operand.hbm [shape: f32[8,128], index: 0, kind: input, shape index: {}]   ;;  %s1046_s1 = inlined_call_operand.hbm [shape: bf16[128,256], index: 1, kind: input, shape index: {}]   ;;  %s1047_s2 = inlined_call_operand.vmem [shape: f32[1,256], index: 2, kind: input, shape index: {}]   ;;  %s1048_s3 = inlined_call_operand.hbm [shape: bf16[256,256], index: 3, kind: input, shape index: {}]   ;;  %s1049_s4 = inlined_call_operand.vmem [shape: f32[1,256], index: 4, kind: input, shape index: {}]   ;;  %s1050_s5 = inlined_call_operand.hbm [shape: bf16[256,128], index: 5, kind: input, shape index: {}]   ;;  %s1051_s6 = inlined_call_operand.vmem [shape: f32[1,128], index: 6, kind: input, shape index: {}]   ;;  %s1052_s7 = inlined_call_operand.hbm [shape: f32[8,128], index: 7, kind: output, shape index: {}]  }
   0x1   :  { %13 = vsyncpa [#allocation6], 0 }
   0x2   :  { %14 = vsyncpa [#allocation9], 0 }
   0x3   :  { %15 = vsyncpa [#allocation4], 0  ;;  %s971_s24 = smov [#allocation5]  }
   0x4   :  { %s31_s25 = sshll.u32 %s971_s24, 4  ;;  %s32_s25 = int_to_ptr.vmem [resolvable:$true] %s31_s25 }
   0x5   :  { %s871_s26 = scalar_lea.vmem %s32_s25, 2048  ;;  %p876_p1 = scmp.lt.s32.totalorder %s32_s25, %s32_s25 }
   0x6   :  { %p872_p0 = scmp.ne.s32.totalorder %s32_s25, %s871_s26  ;;  %p877_p2 = scmp.lt.s32.totalorder %s871_s26, %s871_s26 }
   0x8   :  { %p878_p3 = por %p877_p2, %p876_p1 }
   0xa   :  { %p879_p4 = pnand %p878_p3, %p872_p0 }
   0xc   :  { %882 = shalt.err (!%p879_p4)
}
   0xd   :  { %s972_s27 = smov 128   ;;  %s973_s28 = smov 8  }
   0xe   :  { %37 = dma.hbm_to_vmem [thread:$0]  %s1046_s1, 2048, %s32_s25, [#allocation6], %s972_s27, %s972_s27, %s973_s28  }
   0xf   :  { %s974_s8 = smov [#allocation2]   ;;  %s975_s10 = smov [#allocation7]  }
  0x10   :  { %s22_s9 = sshll.u32 %s974_s8, 4  ;;  %s45_s11 = sshll.u32 %s975_s10, 4  ;;  %s23_s9 = int_to_ptr.vmem [resolvable:$true] %s22_s9  ;;  %s46_s11 = int_to_ptr.vmem [resolvable:$true] %s45_s11 }
  0x11   :  { %s891_s12 = scalar_lea.vmem %s23_s9, 128  ;;  %p896_p6 = scmp.lt.s32.totalorder %s23_s9, %s23_s9 }
  0x12   :  { %p892_p5 = scmp.ne.s32.totalorder %s23_s9, %s891_s12  ;;  %p897_p7 = scmp.lt.s32.totalorder %s891_s12, %s891_s12 }
  0x14   :  { %p898_p8 = por %p897_p7, %p896_p6 }
  0x16   :  { %p899_p9 = pnand %p898_p8, %p892_p5 }
  0x18   :  { %902 = shalt.err (!%p899_p9)
}
  0x19   :  { %25 = dma.hbm_to_vmem [thread:$0]  %s1045_s0, 128, %s23_s9, [#allocation3]  }
  0x1a   :  { %s911_s15 = scalar_lea.vmem %s46_s11, 4096  ;;  %p916_p11 = scmp.lt.s32.totalorder %s46_s11, %s46_s11 }
  0x1b   :  { %p912_p10 = scmp.ne.s32.totalorder %s46_s11, %s911_s15  ;;  %p917_p12 = scmp.lt.s32.totalorder %s911_s15, %s911_s15 }
  0x1d   :  { %p918_p13 = por %p917_p12, %p916_p11 }
  0x1f   :  { %p919_p0 = pnand %p918_p13, %p912_p10 }
  0x21   :  { %922 = shalt.err (!%p919_p0)
}
  0x22   :  { %51 = dma.hbm_to_vmem [thread:$0]  %s1048_s3, 4096, %s46_s11, [#allocation6], %s972_s27, %s972_s27, %s973_s28  }
  0x23   :  { %s976_s17 = smov [#allocation8]  }
  0x24   :  { %s59_s18 = sshll.u32 %s976_s17, 4  ;;  %s60_s18 = int_to_ptr.vmem [resolvable:$true] %s59_s18 }
  0x25   :  { %s931_s19 = scalar_lea.vmem %s60_s18, 2048  ;;  %p936_p2 = scmp.lt.s32.totalorder %s60_s18, %s60_s18 }
  0x26   :  { %p932_p1 = scmp.ne.s32.totalorder %s60_s18, %s931_s19  ;;  %p937_p3 = scmp.lt.s32.totalorder %s931_s19, %s931_s19 }
  0x28   :  { %p938_p4 = por %p937_p3, %p936_p2 }
  0x2a   :  { %p939_p5 = pnand %p938_p4, %p932_p1 }
  0x2c   :  { %942 = shalt.err (!%p939_p5)
}
  0x2d   :  { %s977_s0 = smov 64   ;;  %s978_s20 = smov 4  }
  0x2e   :  { %65 = dma.hbm_to_vmem [thread:$0]  %s1050_s5, 2048, %s60_s18, [#allocation9], %s977_s0, %s977_s0, %s978_s20  }
  0x2f   :  { %963 = dma.done.wait [#allocation3], 128  }
  0x30   :  { %964 = vsyncadd [#allocation3], 4294967168 }
  0x31   :  { %965 = dma.done.wait [#allocation6], 6144  }
  0x32   :  { %966 = vsyncadd [#allocation6], 4294961152 }
  0x33   :  { %967 = dma.done.wait [#allocation9], 2048  }
  0x34   :  { %968 = vsyncadd [#allocation9], 4294965248  ;;  %v979_v0 = vmov 0   ;;  %v775_v1 = vld [vmem:[#allocation5 + $0x74] ss:$8 sps:$4 sm:$0xff]   ;;  %v851_v55 = vld [vmem:[#allocation8 + $0x68] sm:$0xff]   ;;  %v101_v63 = vlaneseq }
  0x35   :  { %223 = vmatprep.mubr.bf16.mxu0 %v979_v0  ;;  %v777_v2 = vld [vmem:[#allocation5 + $0x70] ss:$8 sps:$4 sm:$0xff]   ;;  %191 = vmatprep.subr.bf16.mxu0 %v775_v1  ;;  %v778_v3 = vld [vmem:[#allocation5 + $0x64] ss:$8 sps:$4 sm:$0xff]   ;;  %v780_v4 = vld [vmem:[#allocation5 + $0x60] ss:$8 sps:$4 sm:$0xff]  }
  0x36   :  { %192 = vmatpush1.bf16.msra.mxu0 %v777_v2  ;;  %v781_v5 = vld [vmem:[#allocation5 + $0x54] ss:$8 sps:$4 sm:$0xff]   ;;  %v783_v6 = vld [vmem:[#allocation5 + $0x50] ss:$8 sps:$4 sm:$0xff]   ;;  %v784_v7 = vld [vmem:[#allocation5 + $0x44] ss:$8 sps:$4 sm:$0xff]  }
  0x37   :  { %193 = vmatprep.subr.bf16.mxu0 %v778_v3  ;;  %v786_v8 = vld [vmem:[#allocation5 + $0x40] ss:$8 sps:$4 sm:$0xff]   ;;  %v787_v9 = vld [vmem:[#allocation5 + $0x34] ss:$8 sps:$4 sm:$0xff]   ;;  %v801_v11 = vld [vmem:[#allocation7 + $0x70] ss:$8 sps:$4 sm:$0xff]  }
  0x38   :  { %v799_v10 = vld [vmem:[#allocation7 + $0x74] ss:$8 sps:$4 sm:$0xff]   ;;  %v802_v12 = vld [vmem:[#allocation7 + $0x64] ss:$8 sps:$4 sm:$0xff]   ;;  %v789_v13 = vld [vmem:[#allocation5 + $0x30] ss:$8 sps:$4 sm:$0xff]  }
  0x39   :  { %440 = vmatprep.subr.bf16.mxu1 %v799_v10  ;;  %v804_v14 = vld [vmem:[#allocation7 + $0x60] ss:$8 sps:$4 sm:$0xff]   ;;  %v805_v15 = vld [vmem:[#allocation7 + $0x54] ss:$8 sps:$4 sm:$0xff]   ;;  %v790_v16 = vld [vmem:[#allocation5 + $0x24] ss:$8 sps:$4 sm:$0xff]  }
  0x3a   :  { %194 = vmatpush1.bf16.msra.mxu0 %v780_v4  ;;  %441 = vmatpush1.bf16.msra.mxu1 %v801_v11  ;;  %v792_v17 = vld [vmem:[#allocation5 + $0x20] ss:$8 sps:$4 sm:$0xff]   ;;  %v807_v18 = vld [vmem:[#allocation7 + $0x50] ss:$8 sps:$4 sm:$0xff]   ;;  %v808_v19 = vld [vmem:[#allocation7 + $0x44] ss:$8 sps:$4 sm:$0xff]  }
  0x3b   :  { %195 = vmatprep.subr.bf16.mxu0 %v781_v5  ;;  %442 = vmatprep.subr.bf16.mxu1 %v802_v12  ;;  %v793_v20 = vld [vmem:[#allocation5 + $0x14] ss:$8 sps:$4 sm:$0xff]   ;;  %v795_v21 = vld [vmem:[#allocation5 + $0x10] ss:$8 sps:$4 sm:$0xff]   ;;  %v810_v22 = vld [vmem:[#allocation7 + $0x40] ss:$8 sps:$4 sm:$0xff]  }
  0x3c   :  { %v811_v23 = vld [vmem:[#allocation7 + $0x34] ss:$8 sps:$4 sm:$0xff]   ;;  %v796_v24 = vld [vmem:[#allocation5 + $0x4] ss:$8 sps:$4 sm:$0xff]   ;;  %v798_v25 = vld [vmem:[#allocation5] ss:$8 sps:$4 sm:$0xff]  }
  0x3d   :  { %v81_v26 = vld [vmem:[#allocation2] sm:$0xff]  ;;  %v814_v28 = vld [vmem:[#allocation7 + $0x24] ss:$8 sps:$4 sm:$0xff]   ;;  %v816_v29 = vld [vmem:[#allocation7 + $0x20] ss:$8 sps:$4 sm:$0xff]   ;;  %v102_v0 = vshrl.u32 %v101_v63, 7 }
  0x3e   :  { %196 = vmatpush1.bf16.msra.mxu0 %v783_v6  ;;  %443 = vmatpush1.bf16.msra.mxu1 %v804_v14  ;;  %v813_v27 = vld [vmem:[#allocation7 + $0x30] ss:$8 sps:$4 sm:$0xff]   ;;  %v817_v30 = vld [vmem:[#allocation7 + $0x14] ss:$8 sps:$4 sm:$0xff]   ;;  %v82_v31 = vpack.c.bf16 %v81_v26, %v81_v26  ;;  %v820_v33 = vld [vmem:[#allocation7 + $0x4] ss:$8 sps:$4 sm:$0xff]  }
  0x3f   :  { %197 = vmatprep.subr.bf16.mxu0 %v784_v7  ;;  %444 = vmatprep.subr.bf16.mxu1 %v805_v15  ;;  %v819_v32 = vld [vmem:[#allocation7 + $0x10] ss:$8 sps:$4 sm:$0xff]   ;;  %v822_v34 = vld [vmem:[#allocation7] ss:$8 sps:$4 sm:$0xff]   ;;  %v823_v35 = vld [vmem:[#allocation7 + $0xf4] ss:$8 sps:$4 sm:$0xff]  }
  0x40   :  { %v825_v36 = vld [vmem:[#allocation7 + $0xf0] ss:$8 sps:$4 sm:$0xff]   ;;  %v826_v37 = vld [vmem:[#allocation7 + $0xe4] ss:$8 sps:$4 sm:$0xff]   ;;  %v828_v38 = vld [vmem:[#allocation7 + $0xe0] ss:$8 sps:$4 sm:$0xff]  }
  0x41   :  { %v829_v39 = vld [vmem:[#allocation7 + $0xd4] ss:$8 sps:$4 sm:$0xff]   ;;  %v831_v40 = vld [vmem:[#allocation7 + $0xd0] ss:$8 sps:$4 sm:$0xff]   ;;  %v832_v41 = vld [vmem:[#allocation7 + $0xc4] ss:$8 sps:$4 sm:$0xff]  }
  0x42   :  { %198 = vmatpush1.bf16.msra.mxu0 %v786_v8  ;;  %445 = vmatpush1.bf16.msra.mxu1 %v807_v18  ;;  %v834_v42 = vld [vmem:[#allocation7 + $0xc0] ss:$8 sps:$4 sm:$0xff]   ;;  %v835_v43 = vld [vmem:[#allocation7 + $0xb4] ss:$8 sps:$4 sm:$0xff]   ;;  %v837_v44 = vld [vmem:[#allocation7 + $0xb0] ss:$8 sps:$4 sm:$0xff]  }
  0x43   :  { %199 = vmatprep.subr.bf16.mxu0 %v787_v9  ;;  %446 = vmatprep.subr.bf16.mxu1 %v808_v19  ;;  %v838_v45 = vld [vmem:[#allocation7 + $0xa4] ss:$8 sps:$4 sm:$0xff]   ;;  %v840_v46 = vld [vmem:[#allocation7 + $0xa0] ss:$8 sps:$4 sm:$0xff]   ;;  %v841_v47 = vld [vmem:[#allocation7 + $0x94] ss:$8 sps:$4 sm:$0xff]  }
  0x44   :  { %v843_v48 = vld [vmem:[#allocation7 + $0x90] ss:$8 sps:$4 sm:$0xff]   ;;  %v844_v49 = vld [vmem:[#allocation7 + $0x84] ss:$8 sps:$4 sm:$0xff]   ;;  %v846_v50 = vld [vmem:[#allocation7 + $0x80] ss:$8 sps:$4 sm:$0xff]  }
  0x45   :  { %v847_v51 = vld [vmem:[#allocation8 + $0x78] sm:$0xff]   ;;  %v849_v53 = vld [vmem:[#allocation8 + $0x70] sm:$0xff]   ;;  %v852_v56 = vld [vmem:[#allocation8 + $0x28] sm:$0xff]   ;;  %v103_v1 = vsub.s32 0, %v102_v0  ;;  %v107_v3 = vsub.s32 1, %v102_v0 }
  0x46   :  { %200 = vmatpush1.bf16.msra.mxu0 %v789_v13  ;;  %447 = vmatpush1.bf16.msra.mxu1 %v810_v22  ;;  %v848_v52 = vld [vmem:[#allocation8 + $0x38] sm:$0xff]   ;;  %v850_v54 = vld [vmem:[#allocation8 + $0x30] sm:$0xff]   ;;  %v853_v57 = vld [vmem:[#allocation8 + $0x60] sm:$0xff]  }
  0x47   :  { %201 = vmatprep.subr.bf16.mxu0 %v790_v16  ;;  %448 = vmatprep.subr.bf16.mxu1 %v811_v23  ;;  %v854_v58 = vld [vmem:[#allocation8 + $0x20] sm:$0xff]   ;;  %v855_v59 = vld [vmem:[#allocation8 + $0x58] sm:$0xff]   ;;  %v857_v61 = vld [vmem:[#allocation8 + $0x50] sm:$0xff]  }
  0x48   :  { %v856_v60 = vld [vmem:[#allocation8 + $0x18] sm:$0xff]   ;;  %v858_v62 = vld [vmem:[#allocation8 + $0x10] sm:$0xff]   ;;  %v859_v16 = vld [vmem:[#allocation8 + $0x48] sm:$0xff]  }
  0x49   :  { %v99_v2 = vld [vmem:[%s1047_s2] sm:$0x3]  ;;  %v861_v18 = vld [vmem:[#allocation8 + $0x40] sm:$0xff]  }
  0x4a   :  { %202 = vmatpush1.bf16.msra.mxu0 %v792_v17  ;;  %449 = vmatpush1.bf16.msra.mxu1 %v813_v27  ;;  %v104_v4 = vrot.slane %v99_v2, %v103_v1  ;;  %v108_v5 = vrot.slane %v99_v2, %v107_v3  ;;  %v860_v17 = vld [vmem:[#allocation8 + $0x8] sm:$0xff]   ;;  %v862_v19 = vld [vmem:[#allocation8] sm:$0xff]  }
  0x4b   :  { %203 = vmatprep.subr.bf16.mxu0 %v793_v20  ;;  %450 = vmatprep.subr.bf16.mxu1 %v814_v28  ;;  %v268_v20 = vld [vmem:[%s1049_s4] sm:$0x3]  ;;  %s980_s4 = smov [#allocation10]  }
  0x4c   :  { %v277_v22 = vrot.slane %v268_v20, %v107_v3  ;;  %s667_s26 = sshll.u32 %s980_s4, 4  ;;  %s668_s26 = int_to_ptr.vmem [resolvable:$true] %s667_s26 }
  0x4d   :  { %s943_s27 = scalar_lea.vmem %s668_s26, 128  ;;  %p948_p7 = scmp.lt.s32.totalorder %s668_s26, %s668_s26 }
  0x4e   :  { %204 = vmatpush1.bf16.msra.mxu0 %v795_v21  ;;  %451 = vmatpush1.bf16.msra.mxu1 %v816_v29  ;;  %v273_v21 = vrot.slane %v268_v20, %v103_v1  ;;  %p944_p6 = scmp.ne.s32.totalorder %s668_s26, %s943_s27  ;;  %p949_p8 = scmp.lt.s32.totalorder %s943_s27, %s943_s27 }
  0x4f   :  { %205 = vmatprep.subr.bf16.mxu0 %v796_v24  ;;  %452 = vmatprep.subr.bf16.mxu1 %v817_v30 }
  0x50   :  { %p950_p9 = por %p949_p8, %p948_p7 }
  0x52   :  { %206 = vmatpush1.bf16.msra.mxu0 %v798_v25  ;;  %453 = vmatpush1.bf16.msra.mxu1 %v819_v32  ;;  %p951_p10 = pnand %p950_p9, %p944_p6 }
  0x53   :  { %454 = vmatprep.subr.bf16.mxu1 %v820_v33  ;;  %743 = vmatprep.subr.bf16.mxu0 %v847_v51 }
  0x55   :  { %224 = vmatmul.mubr.bf16.vlgmr.msra.gmra.mxu0 %v82_v31 }
  0x56   :  { %455 = vmatpush1.bf16.msra.mxu1 %v822_v34  ;;  %744 = vmatpush3.bf16.msra.mxu0 %v848_v52  ;;  %v726_v34 = vld [vmem:[%s1051_s6] ss:$0 sm:$0xff] }
  0x57   :  { %456 = vmatprep.subr.bf16.mxu1 %v823_v35  ;;  %745 = vmatprep.subr.bf16.mxu0 %v849_v53 }
  0x5a   :  { %457 = vmatpush2.bf16.msra.mxu1 %v825_v36  ;;  %746 = vmatpush3.bf16.msra.mxu0 %v850_v54 }
  0x5b   :  { %458 = vmatprep.subr.bf16.mxu1 %v826_v37  ;;  %747 = vmatprep.subr.bf16.mxu0 %v851_v55 }
  0x5e   :  { %459 = vmatpush2.bf16.msra.mxu1 %v828_v38  ;;  %748 = vmatpush3.bf16.msra.mxu0 %v852_v56 }
  0x5f   :  { %460 = vmatprep.subr.bf16.mxu1 %v829_v39  ;;  %749 = vmatprep.subr.bf16.mxu0 %v853_v57 }
  0x62   :  { %461 = vmatpush2.bf16.msra.mxu1 %v831_v40  ;;  %750 = vmatpush3.bf16.msra.mxu0 %v854_v58 }
  0x63   :  { %462 = vmatprep.subr.bf16.mxu1 %v832_v41  ;;  %751 = vmatprep.subr.bf16.mxu0 %v855_v59 }
  0x66   :  { %463 = vmatpush2.bf16.msra.mxu1 %v834_v42  ;;  %752 = vmatpush3.bf16.msra.mxu0 %v856_v60 }
  0x67   :  { %464 = vmatprep.subr.bf16.mxu1 %v835_v43  ;;  %753 = vmatprep.subr.bf16.mxu0 %v857_v61 }
  0x6a   :  { %465 = vmatpush2.bf16.msra.mxu1 %v837_v44  ;;  %754 = vmatpush3.bf16.msra.mxu0 %v858_v62 }
  0x6b   :  { %466 = vmatprep.subr.bf16.mxu1 %v838_v45  ;;  %755 = vmatprep.subr.bf16.mxu0 %v859_v16 }
  0x6e   :  { %467 = vmatpush2.bf16.msra.mxu1 %v840_v46  ;;  %756 = vmatpush3.bf16.msra.mxu0 %v860_v17 }
  0x6f   :  { %468 = vmatprep.subr.bf16.mxu1 %v841_v47  ;;  %757 = vmatprep.subr.bf16.mxu0 %v861_v18 }
  0x72   :  { %469 = vmatpush2.bf16.msra.mxu1 %v843_v48  ;;  %758 = vmatpush3.bf16.msra.mxu0 %v862_v19 }
  0x73   :  { %470 = vmatprep.subr.bf16.mxu1 %v844_v49 }
  0x76   :  { %471 = vmatpush2.bf16.msra.mxu1 %v846_v50 }
 0x115   :  { %v225_v6 = vpop.f32.mrf.mxu0 }
 0x116   :  { %v226_v7 = vadd.f32 %v225_v6, %v104_v4 }
 0x117   :  { %v227_v8 = vpop.f32.mrf.mxu0 }
 0x118   :  { %v228_v9 = vadd.f32 %v227_v8, %v108_v5  ;;  %v232_v10 = vmax.f32 %v226_v7, 0.0 }
 0x119   :  { %v229_v11 = vpop.f32.mrf.mxu0 }
 0x11a   :  { %v233_v12 = vmax.f32 %v228_v9, 0.0  ;;  %v234_v15 = vpack.c.bf16 %v232_v10, %v232_v10 }
 0x11b   :  { %v230_v13 = vpop.f32.mrf.mxu0 }
 0x11c   :  { %v235_v14 = vpack.c.bf16 %v233_v12, %v233_v12 }
 0x11e   :  { %472 = vmatprep.mubr.bf16.mxu1 %v235_v14 }
 0x11f   :  { %473 = vmatmul.mubr.bf16.vlgmr.msra.gmra.mxu1 %v234_v15 }
 0x1df   :  { %v474_v23 = vpop.f32.mrf.mxu1 }
 0x1e0   :  { %v475_v24 = vadd.f32 %v474_v23, %v273_v21 }
 0x1e1   :  { %v476_v25 = vpop.f32.mrf.mxu1 }
 0x1e2   :  { %v477_v26 = vadd.f32 %v476_v25, %v277_v22  ;;  %v481_v27 = vmax.f32 %v475_v24, 0.0 }
 0x1e3   :  { %v478_v28 = vpop.f32.mrf.mxu1 }
 0x1e4   :  { %v482_v29 = vmax.f32 %v477_v26, 0.0  ;;  %v483_v32 = vpack.c.bf16 %v481_v27, %v481_v27 }
 0x1e5   :  { %v479_v30 = vpop.f32.mrf.mxu1 }
 0x1e6   :  { %v484_v31 = vpack.c.bf16 %v482_v29, %v482_v29 }
 0x1e8   :  { %652 = vmatprep.mubr.bf16.mxu0 %v484_v31 }
 0x1e9   :  { %653 = vmatmul.mubr.bf16.vlgmr.msra.gmra.mxu0 %v483_v32 }
 0x2a9   :  { %v759_v33 = vpop.f32.mrf.mxu0 }
 0x2ab   :  { %v760_v35 = vpop.f32.mrf.mxu0 }
 0x2ac   :  { %v761_v36 = vadd.f32 %v760_v35, %v759_v33 }
 0x2ad   :  { %v762_v37 = vpop.f32.mrf.mxu0 }
 0x2ae   :  { %v655_v38 = vadd.f32 %v761_v36, %v726_v34 }
 0x2af   :  { %v763_v39 = vpop.f32.mrf.mxu0 }
 0x2b0   :  { %660 = vst [vmem:[#allocation10] sm:$0xff] %v655_v38 }
 0x2b1   :  { %954 = shalt.err (!%p951_p10)
}
 0x2b2   :  { %670 = dma.vmem_to_hbm [thread:$0]  %s668_s26, 128, %s1052_s7, [#allocation4]  }
 0x2b3   :  { %969 = dma.done.wait [#allocation4], 128  }
 0x2b4   :  { %970 = vsyncadd [#allocation4], 4294967168 }
 0x2b5   :  { %674 = vsyncpa [#allocation3], 1 }
 0x2b6   :  { %675 = vsyncpa [#allocation6], 1 }
 0x2b7   :  { %676 = vsyncpa [#allocation9], 1 }
 0x2b8   :  { %677 = vsyncpa [#allocation4], 1 }

// kernel: tpu_custom_call.1
= control target key start
LH: loop header
LB: loop body
LE: loop exit
PB: predicated region body
PF: predicated region fallthrough
CT: control target
= control target key end

     0   :  { %12 = vsyncpa [#allocation3], 0  ;;  %s1045_s0 = inlined_call_operand.hbm [shape: f32[8,128], index: 0, kind: input, shape index: {}]   ;;  %s1046_s1 = inlined_call_operand.hbm [shape: bf16[128,256], index: 1, kind: input, shape index: {}]   ;;  %s1047_s2 = inlined_call_operand.vmem [shape: f32[1,256], index: 2, kind: input, shape index: {}]   ;;  %s1048_s3 = inlined_call_operand.hbm [shape: bf16[256,256], index: 3, kind: input, shape index: {}]   ;;  %s1049_s4 = inlined_call_operand.vmem [shape: f32[1,256], index: 4, kind: input, shape index: {}]   ;;  %s1050_s5 = inlined_call_operand.hbm [shape: bf16[256,128], index: 5, kind: input, shape index: {}]   ;;  %s1051_s6 = inlined_call_operand.vmem [shape: f32[1,128], index: 6, kind: input, shape index: {}]   ;;  %s1052_s7 = inlined_call_operand.hbm [shape: f32[8,128], index: 7, kind: output, shape index: {}]  }
   0x1   :  { %13 = vsyncpa [#allocation6], 0 }
   0x2   :  { %14 = vsyncpa [#allocation9], 0 }
   0x3   :  { %15 = vsyncpa [#allocation4], 0  ;;  %s971_s24 = smov [#allocation5]  }
   0x4   :  { %s31_s25 = sshll.u32 %s971_s24, 4  ;;  %s32_s25 = int_to_ptr.vmem [resolvable:$true] %s31_s25 }
   0x5   :  { %s871_s26 = scalar_lea.vmem %s32_s25, 2048  ;;  %p876_p1 = scmp.lt.s32.totalorder %s32_s25, %s32_s25 }
   0x6   :  { %p872_p0 = scmp.ne.s32.totalorder %s32_s25, %s871_s26  ;;  %p877_p2 = scmp.lt.s32.totalorder %s871_s26, %s871_s26 }
   0x8   :  { %p878_p3 = por %p877_p2, %p876_p1 }
   0xa   :  { %p879_p4 = pnand %p878_p3, %p872_p0 }
   0xc   :  { %882 = shalt.err (!%p879_p4)
}
   0xd   :  { %s972_s27 = smov 128   ;;  %s973_s28 = smov 8  }
   0xe   :  { %37 = dma.hbm_to_vmem [thread:$0]  %s1046_s1, 2048, %s32_s25, [#allocation6], %s972_s27, %s972_s27, %s973_s28  }
   0xf   :  { %s974_s8 = smov [#allocation2]   ;;  %s975_s10 = smov [#allocation7]  }
  0x10   :  { %s22_s9 = sshll.u32 %s974_s8, 4  ;;  %s45_s11 = sshll.u32 %s975_s10, 4  ;;  %s23_s9 = int_to_ptr.vmem [resolvable:$true] %s22_s9  ;;  %s46_s11 = int_to_ptr.vmem [resolvable:$true] %s45_s11 }
  0x11   :  { %s891_s12 = scalar_lea.vmem %s23_s9, 128  ;;  %p896_p6 = scmp.lt.s32.totalorder %s23_s9, %s23_s9 }
  0x12   :  { %p892_p5 = scmp.ne.s32.totalorder %s23_s9, %s891_s12  ;;  %p897_p7 = scmp.lt.s32.totalorder %s891_s12, %s891_s12 }
  0x14   :  { %p898_p8 = por %p897_p7, %p896_p6 }
  0x16   :  { %p899_p9 = pnand %p898_p8, %p892_p5 }
  0x18   :  { %902 = shalt.err (!%p899_p9)
}
  0x19   :  { %25 = dma.hbm_to_vmem [thread:$0]  %s1045_s0, 128, %s23_s9, [#allocation3]  }
  0x1a   :  { %s911_s15 = scalar_lea.vmem %s46_s11, 4096  ;;  %p916_p11 = scmp.lt.s32.totalorder %s46_s11, %s46_s11 }
  0x1b   :  { %p912_p10 = scmp.ne.s32.totalorder %s46_s11, %s911_s15  ;;  %p917_p12 = scmp.lt.s32.totalorder %s911_s15, %s911_s15 }
  0x1d   :  { %p918_p13 = por %p917_p12, %p916_p11 }
  0x1f   :  { %p919_p0 = pnand %p918_p13, %p912_p10 }
  0x21   :  { %922 = shalt.err (!%p919_p0)
}
  0x22   :  { %51 = dma.hbm_to_vmem [thread:$0]  %s1048_s3, 4096, %s46_s11, [#allocation6], %s972_s27, %s972_s27, %s973_s28  }
  0x23   :  { %s976_s17 = smov [#allocation8]  }
  0x24   :  { %s59_s18 = sshll.u32 %s976_s17, 4  ;;  %s60_s18 = int_to_ptr.vmem [resolvable:$true] %s59_s18 }
  0x25   :  { %s931_s19 = scalar_lea.vmem %s60_s18, 2048  ;;  %p936_p2 = scmp.lt.s32.totalorder %s60_s18, %s60_s18 }
  0x26   :  { %p932_p1 = scmp.ne.s32.totalorder %s60_s18, %s931_s19  ;;  %p937_p3 = scmp.lt.s32.totalorder %s931_s19, %s931_s19 }
  0x28   :  { %p938_p4 = por %p937_p3, %p936_p2 }
  0x2a   :  { %p939_p5 = pnand %p938_p4, %p932_p1 }
  0x2c   :  { %942 = shalt.err (!%p939_p5)
}
  0x2d   :  { %s977_s0 = smov 64   ;;  %s978_s20 = smov 4  }
  0x2e   :  { %65 = dma.hbm_to_vmem [thread:$0]  %s1050_s5, 2048, %s60_s18, [#allocation9], %s977_s0, %s977_s0, %s978_s20  }
  0x2f   :  { %963 = dma.done.wait [#allocation3], 128  }
  0x30   :  { %964 = vsyncadd [#allocation3], 4294967168 }
  0x31   :  { %965 = dma.done.wait [#allocation6], 6144  }
  0x32   :  { %966 = vsyncadd [#allocation6], 4294961152 }
  0x33   :  { %967 = dma.done.wait [#allocation9], 2048  }
  0x34   :  { %968 = vsyncadd [#allocation9], 4294965248  ;;  %v979_v0 = vmov 0   ;;  %v775_v1 = vld [vmem:[#allocation5 + $0x74] ss:$8 sps:$4 sm:$0xff]   ;;  %v851_v55 = vld [vmem:[#allocation8 + $0x68] sm:$0xff]   ;;  %v101_v63 = vlaneseq }
  0x35   :  { %223 = vmatprep.mubr.bf16.mxu0 %v979_v0  ;;  %v777_v2 = vld [vmem:[#allocation5 + $0x70] ss:$8 sps:$4 sm:$0xff]   ;;  %191 = vmatprep.subr.bf16.mxu0 %v775_v1  ;;  %v778_v3 = vld [vmem:[#allocation5 + $0x64] ss:$8 sps:$4 sm:$0xff]   ;;  %v780_v4 = vld [vmem:[#allocation5 + $0x60] ss:$8 sps:$4 sm:$0xff]  }
  0x36   :  { %192 = vmatpush1.bf16.msra.mxu0 %v777_v2  ;;  %v781_v5 = vld [vmem:[#allocation5 + $0x54] ss:$8 sps:$4 sm:$0xff]   ;;  %v783_v6 = vld [vmem:[#allocation5 + $0x50] ss:$8 sps:$4 sm:$0xff]   ;;  %v784_v7 = vld [vmem:[#allocation5 + $0x44] ss:$8 sps:$4 sm:$0xff]  }
  0x37   :  { %193 = vmatprep.subr.bf16.mxu0 %v778_v3  ;;  %v786_v8 = vld [vmem:[#allocation5 + $0x40] ss:$8 sps:$4 sm:$0xff]   ;;  %v787_v9 = vld [vmem:[#allocation5 + $0x34] ss:$8 sps:$4 sm:$0xff]   ;;  %v801_v11 = vld [vmem:[#allocation7 + $0x70] ss:$8 sps:$4 sm:$0xff]  }
  0x38   :  { %v799_v10 = vld [vmem:[#allocation7 + $0x74] ss:$8 sps:$4 sm:$0xff]   ;;  %v802_v12 = vld [vmem:[#allocation7 + $0x64] ss:$8 sps:$4 sm:$0xff]   ;;  %v789_v13 = vld [vmem:[#allocation5 + $0x30] ss:$8 sps:$4 sm:$0xff]  }
  0x39   :  { %440 = vmatprep.subr.bf16.mxu1 %v799_v10  ;;  %v804_v14 = vld [vmem:[#allocation7 + $0x60] ss:$8 sps:$4 sm:$0xff]   ;;  %v805_v15 = vld [vmem:[#allocation7 + $0x54] ss:$8 sps:$4 sm:$0xff]   ;;  %v790_v16 = vld [vmem:[#allocation5 + $0x24] ss:$8 sps:$4 sm:$0xff]  }
  0x3a   :  { %194 = vmatpush1.bf16.msra.mxu0 %v780_v4  ;;  %441 = vmatpush1.bf16.msra.mxu1 %v801_v11  ;;  %v792_v17 = vld [vmem:[#allocation5 + $0x20] ss:$8 sps:$4 sm:$0xff]   ;;  %v807_v18 = vld [vmem:[#allocation7 + $0x50] ss:$8 sps:$4 sm:$0xff]   ;;  %v808_v19 = vld [vmem:[#allocation7 + $0x44] ss:$8 sps:$4 sm:$0xff]  }
  0x3b   :  { %195 = vmatprep.subr.bf16.mxu0 %v781_v5  ;;  %442 = vmatprep.subr.bf16.mxu1 %v802_v12  ;;  %v793_v20 = vld [vmem:[#allocation5 + $0x14] ss:$8 sps:$4 sm:$0xff]   ;;  %v795_v21 = vld [vmem:[#allocation5 + $0x10] ss:$8 sps:$4 sm:$0xff]   ;;  %v810_v22 = vld [vmem:[#allocation7 + $0x40] ss:$8 sps:$4 sm:$0xff]  }
  0x3c   :  { %v811_v23 = vld [vmem:[#allocation7 + $0x34] ss:$8 sps:$4 sm:$0xff]   ;;  %v796_v24 = vld [vmem:[#allocation5 + $0x4] ss:$8 sps:$4 sm:$0xff]   ;;  %v798_v25 = vld [vmem:[#allocation5] ss:$8 sps:$4 sm:$0xff]  }
  0x3d   :  { %v81_v26 = vld [vmem:[#allocation2] sm:$0xff]  ;;  %v814_v28 = vld [vmem:[#allocation7 + $0x24] ss:$8 sps:$4 sm:$0xff]   ;;  %v816_v29 = vld [vmem:[#allocation7 + $0x20] ss:$8 sps:$4 sm:$0xff]   ;;  %v102_v0 = vshrl.u32 %v101_v63, 7 }
  0x3e   :  { %196 = vmatpush1.bf16.msra.mxu0 %v783_v6  ;;  %443 = vmatpush1.bf16.msra.mxu1 %v804_v14  ;;  %v813_v27 = vld [vmem:[#allocation7 + $0x30] ss:$8 sps:$4 sm:$0xff]   ;;  %v817_v30 = vld [vmem:[#allocation7 + $0x14] ss:$8 sps:$4 sm:$0xff]   ;;  %v82_v31 = vpack.c.bf16 %v81_v26, %v81_v26  ;;  %v820_v33 = vld [vmem:[#allocation7 + $0x4] ss:$8 sps:$4 sm:$0xff]  }
  0x3f   :  { %197 = vmatprep.subr.bf16.mxu0 %v784_v7  ;;  %444 = vmatprep.subr.bf16.mxu1 %v805_v15  ;;  %v819_v32 = vld [vmem:[#allocation7 + $0x10] ss:$8 sps:$4 sm:$0xff]   ;;  %v822_v34 = vld [vmem:[#allocation7] ss:$8 sps:$4 sm:$0xff]   ;;  %v823_v35 = vld [vmem:[#allocation7 + $0xf4] ss:$8 sps:$4 sm:$0xff]  }
  0x40   :  { %v825_v36 = vld [vmem:[#allocation7 + $0xf0] ss:$8 sps:$4 sm:$0xff]   ;;  %v826_v37 = vld [vmem:[#allocation7 + $0xe4] ss:$8 sps:$4 sm:$0xff]   ;;  %v828_v38 = vld [vmem:[#allocation7 + $0xe0] ss:$8 sps:$4 sm:$0xff]  }
  0x41   :  { %v829_v39 = vld [vmem:[#allocation7 + $0xd4] ss:$8 sps:$4 sm:$0xff]   ;;  %v831_v40 = vld [vmem:[#allocation7 + $0xd0] ss:$8 sps:$4 sm:$0xff]   ;;  %v832_v41 = vld [vmem:[#allocation7 + $0xc4] ss:$8 sps:$4 sm:$0xff]  }
  0x42   :  { %198 = vmatpush1.bf16.msra.mxu0 %v786_v8  ;;  %445 = vmatpush1.bf16.msra.mxu1 %v807_v18  ;;  %v834_v42 = vld [vmem:[#allocation7 + $0xc0] ss:$8 sps:$4 sm:$0xff]   ;;  %v835_v43 = vld [vmem:[#allocation7 + $0xb4] ss:$8 sps:$4 sm:$0xff]   ;;  %v837_v44 = vld [vmem:[#allocation7 + $0xb0] ss:$8 sps:$4 sm:$0xff]  }
  0x43   :  { %199 = vmatprep.subr.bf16.mxu0 %v787_v9  ;;  %446 = vmatprep.subr.bf16.mxu1 %v808_v19  ;;  %v838_v45 = vld [vmem:[#allocation7 + $0xa4] ss:$8 sps:$4 sm:$0xff]   ;;  %v840_v46 = vld [vmem:[#allocation7 + $0xa0] ss:$8 sps:$4 sm:$0xff]   ;;  %v841_v47 = vld [vmem:[#allocation7 + $0x94] ss:$8 sps:$4 sm:$0xff]  }
  0x44   :  { %v843_v48 = vld [vmem:[#allocation7 + $0x90] ss:$8 sps:$4 sm:$0xff]   ;;  %v844_v49 = vld [vmem:[#allocation7 + $0x84] ss:$8 sps:$4 sm:$0xff]   ;;  %v846_v50 = vld [vmem:[#allocation7 + $0x80] ss:$8 sps:$4 sm:$0xff]  }
  0x45   :  { %v847_v51 = vld [vmem:[#allocation8 + $0x78] sm:$0xff]   ;;  %v849_v53 = vld [vmem:[#allocation8 + $0x70] sm:$0xff]   ;;  %v852_v56 = vld [vmem:[#allocation8 + $0x28] sm:$0xff]   ;;  %v103_v1 = vsub.s32 0, %v102_v0  ;;  %v107_v3 = vsub.s32 1, %v102_v0 }
  0x46   :  { %200 = vmatpush1.bf16.msra.mxu0 %v789_v13  ;;  %447 = vmatpush1.bf16.msra.mxu1 %v810_v22  ;;  %v848_v52 = vld [vmem:[#allocation8 + $0x38] sm:$0xff]   ;;  %v850_v54 = vld [vmem:[#allocation8 + $0x30] sm:$0xff]   ;;  %v853_v57 = vld [vmem:[#allocation8 + $0x60] sm:$0xff]  }
  0x47   :  { %201 = vmatprep.subr.bf16.mxu0 %v790_v16  ;;  %448 = vmatprep.subr.bf16.mxu1 %v811_v23  ;;  %v854_v58 = vld [vmem:[#allocation8 + $0x20] sm:$0xff]   ;;  %v855_v59 = vld [vmem:[#allocation8 + $0x58] sm:$0xff]   ;;  %v857_v61 = vld [vmem:[#allocation8 + $0x50] sm:$0xff]  }
  0x48   :  { %v856_v60 = vld [vmem:[#allocation8 + $0x18] sm:$0xff]   ;;  %v858_v62 = vld [vmem:[#allocation8 + $0x10] sm:$0xff]   ;;  %v859_v16 = vld [vmem:[#allocation8 + $0x48] sm:$0xff]  }
  0x49   :  { %v99_v2 = vld [vmem:[%s1047_s2] sm:$0x3]  ;;  %v861_v18 = vld [vmem:[#allocation8 + $0x40] sm:$0xff]  }
  0x4a   :  { %202 = vmatpush1.bf16.msra.mxu0 %v792_v17  ;;  %449 = vmatpush1.bf16.msra.mxu1 %v813_v27  ;;  %v104_v4 = vrot.slane %v99_v2, %v103_v1  ;;  %v108_v5 = vrot.slane %v99_v2, %v107_v3  ;;  %v860_v17 = vld [vmem:[#allocation8 + $0x8] sm:$0xff]   ;;  %v862_v19 = vld [vmem:[#allocation8] sm:$0xff]  }
  0x4b   :  { %203 = vmatprep.subr.bf16.mxu0 %v793_v20  ;;  %450 = vmatprep.subr.bf16.mxu1 %v814_v28  ;;  %v268_v20 = vld [vmem:[%s1049_s4] sm:$0x3]  ;;  %s980_s4 = smov [#allocation10]  }
  0x4c   :  { %v277_v22 = vrot.slane %v268_v20, %v107_v3  ;;  %s667_s26 = sshll.u32 %s980_s4, 4  ;;  %s668_s26 = int_to_ptr.vmem [resolvable:$true] %s667_s26 }
  0x4d   :  { %s943_s27 = scalar_lea.vmem %s668_s26, 128  ;;  %p948_p7 = scmp.lt.s32.totalorder %s668_s26, %s668_s26 }
  0x4e   :  { %204 = vmatpush1.bf16.msra.mxu0 %v795_v21  ;;  %451 = vmatpush1.bf16.msra.mxu1 %v816_v29  ;;  %v273_v21 = vrot.slane %v268_v20, %v103_v1  ;;  %p944_p6 = scmp.ne.s32.totalorder %s668_s26, %s943_s27  ;;  %p949_p8 = scmp.lt.s32.totalorder %s943_s27, %s943_s27 }
  0x4f   :  { %205 = vmatprep.subr.bf16.mxu0 %v796_v24  ;;  %452 = vmatprep.subr.bf16.mxu1 %v817_v30 }
  0x50   :  { %p950_p9 = por %p949_p8, %p948_p7 }
  0x52   :  { %206 = vmatpush1.bf16.msra.mxu0 %v798_v25  ;;  %453 = vmatpush1.bf16.msra.mxu1 %v819_v32  ;;  %p951_p10 = pnand %p950_p9, %p944_p6 }
  0x53   :  { %454 = vmatprep.subr.bf16.mxu1 %v820_v33  ;;  %743 = vmatprep.subr.bf16.mxu0 %v847_v51 }
  0x55   :  { %224 = vmatmul.mubr.bf16.vlgmr.msra.gmra.mxu0 %v82_v31 }
  0x56   :  { %455 = vmatpush1.bf16.msra.mxu1 %v822_v34  ;;  %744 = vmatpush3.bf16.msra.mxu0 %v848_v52  ;;  %v726_v34 = vld [vmem:[%s1051_s6] ss:$0 sm:$0xff] }
  0x57   :  { %456 = vmatprep.subr.bf16.mxu1 %v823_v35  ;;  %745 = vmatprep.subr.bf16.mxu0 %v849_v53 }
  0x5a   :  { %457 = vmatpush2.bf16.msra.mxu1 %v825_v36  ;;  %746 = vmatpush3.bf16.msra.mxu0 %v850_v54 }
  0x5b   :  { %458 = vmatprep.subr.bf16.mxu1 %v826_v37  ;;  %747 = vmatprep.subr.bf16.mxu0 %v851_v55 }
  0x5e   :  { %459 = vmatpush2.bf16.msra.mxu1 %v828_v38  ;;  %748 = vmatpush3.bf16.msra.mxu0 %v852_v56 }
  0x5f   :  { %460 = vmatprep.subr.bf16.mxu1 %v829_v39  ;;  %749 = vmatprep.subr.bf16.mxu0 %v853_v57 }
  0x62   :  { %461 = vmatpush2.bf16.msra.mxu1 %v831_v40  ;;  %750 = vmatpush3.bf16.msra.mxu0 %v854_v58 }
  0x63   :  { %462 = vmatprep.subr.bf16.mxu1 %v832_v41  ;;  %751 = vmatprep.subr.bf16.mxu0 %v855_v59 }
  0x66   :  { %463 = vmatpush2.bf16.msra.mxu1 %v834_v42  ;;  %752 = vmatpush3.bf16.msra.mxu0 %v856_v60 }
  0x67   :  { %464 = vmatprep.subr.bf16.mxu1 %v835_v43  ;;  %753 = vmatprep.subr.bf16.mxu0 %v857_v61 }
  0x6a   :  { %465 = vmatpush2.bf16.msra.mxu1 %v837_v44  ;;  %754 = vmatpush3.bf16.msra.mxu0 %v858_v62 }
  0x6b   :  { %466 = vmatprep.subr.bf16.mxu1 %v838_v45  ;;  %755 = vmatprep.subr.bf16.mxu0 %v859_v16 }
  0x6e   :  { %467 = vmatpush2.bf16.msra.mxu1 %v840_v46  ;;  %756 = vmatpush3.bf16.msra.mxu0 %v860_v17 }
  0x6f   :  { %468 = vmatprep.subr.bf16.mxu1 %v841_v47  ;;  %757 = vmatprep.subr.bf16.mxu0 %v861_v18 }
  0x72   :  { %469 = vmatpush2.bf16.msra.mxu1 %v843_v48  ;;  %758 = vmatpush3.bf16.msra.mxu0 %v862_v19 }
  0x73   :  { %470 = vmatprep.subr.bf16.mxu1 %v844_v49 }
  0x76   :  { %471 = vmatpush2.bf16.msra.mxu1 %v846_v50 }
 0x115   :  { %v225_v6 = vpop.f32.mrf.mxu0 }
 0x116   :  { %v226_v7 = vadd.f32 %v225_v6, %v104_v4 }
 0x117   :  { %v227_v8 = vpop.f32.mrf.mxu0 }
 0x118   :  { %v228_v9 = vadd.f32 %v227_v8, %v108_v5  ;;  %v232_v10 = vmax.f32 %v226_v7, 0.0 }
 0x119   :  { %v229_v11 = vpop.f32.mrf.mxu0 }
 0x11a   :  { %v233_v12 = vmax.f32 %v228_v9, 0.0  ;;  %v234_v15 = vpack.c.bf16 %v232_v10, %v232_v10 }
 0x11b   :  { %v230_v13 = vpop.f32.mrf.mxu0 }
 0x11c   :  { %v235_v14 = vpack.c.bf16 %v233_v12, %v233_v12 }
 0x11e   :  { %472 = vmatprep.mubr.bf16.mxu1 %v235_v14 }
 0x11f   :  { %473 = vmatmul.mubr.bf16.vlgmr.msra.gmra.mxu1 %v234_v15 }
 0x1df   :  { %v474_v23 = vpop.f32.mrf.mxu1 }
 0x1e0   :  { %v475_v24 = vadd.f32 %v474_v23, %v273_v21 }
 0x1e1   :  { %v476_v25 = vpop.f32.mrf.mxu1 }
 0x1e2   :  { %v477_v26 = vadd.f32 %v476_v25, %v277_v22  ;;  %v481_v27 = vmax.f32 %v475_v24, 0.0 }
 0x1e3   :  { %v478_v28 = vpop.f32.mrf.mxu1 }
 0x1e4   :  { %v482_v29 = vmax.f32 %v477_v26, 0.0  ;;  %v483_v32 = vpack.c.bf16 %v481_v27, %v481_v27 }
 0x1e5   :  { %v479_v30 = vpop.f32.mrf.mxu1 }
 0x1e6   :  { %v484_v31 = vpack.c.bf16 %v482_v29, %v482_v29 }
 0x1e8   :  { %652 = vmatprep.mubr.bf16.mxu0 %v484_v31 }
 0x1e9   :  { %653 = vmatmul.mubr.bf16.vlgmr.msra.gmra.mxu0 %v483_v32 }
 0x2a9   :  { %v759_v33 = vpop.f32.mrf.mxu0 }
 0x2ab   :  { %v760_v35 = vpop.f32.mrf.mxu0 }
 0x2ac   :  { %v761_v36 = vadd.f32 %v760_v35, %v759_v33 }
 0x2ad   :  { %v762_v37 = vpop.f32.mrf.mxu0 }
 0x2ae   :  { %v655_v38 = vadd.f32 %v761_v36, %v726_v34 }
 0x2af   :  { %v763_v39 = vpop.f32.mrf.mxu0 }
 0x2b0   :  { %660 = vst [vmem:[#allocation10] sm:$0xff] %v655_v38 }
 0x2b1   :  { %954 = shalt.err (!%p951_p10)
}
 0x2b2   :  { %670 = dma.vmem_to_hbm [thread:$0]  %s668_s26, 128, %s1052_s7, [#allocation4]  }
 0x2b3   :  { %969 = dma.done.wait [#allocation4], 128  }
 0x2b4   :  { %970 = vsyncadd [#allocation4], 4294967168 }
 0x2b5   :  { %674 = vsyncpa [#allocation3], 1 }
 0x2b6   :  { %675 = vsyncpa [#allocation6], 1 }
 0x2b7   :  { %676 = vsyncpa [#allocation9], 1 }
 0x2b8   :  { %677 = vsyncpa [#allocation4], 1 }

</bundles_post_ra>
